<compile_context>
chip_gen: v7x
topology: tpu7x:2x2x1
jax: 0.10.0
libtpu: 0.0.40
codegen_flags: <defaults>
</compile_context>

<pallas_src>
import jax
import jax.numpy as jnp
from jax.experimental import pallas as pl
from jax.experimental.pallas import tpu as pltpu


def _round_up(x, m):
    return ((x + m - 1) // m) * m


# ---------------------------------------------------------------------------
# Kernel: one batch tile of softmax(x @ W_t + b). W_t is already (D, F_pad)
# (consumed in stored layout, no in-kernel transpose) and padded bias lanes
# are pre-set to -1e30, so no in-kernel pad masking is needed.
# ---------------------------------------------------------------------------
def _predictor_kernel(x_ref, w_ref, b_ref, o_ref):
    x = x_ref[...]
    if w_ref.dtype != x.dtype:
        # Optional low-precision MXU path (bf16 weights); accumulation is f32.
        x = x.astype(w_ref.dtype)

    # MXU matmul with f32 accumulation.
    logits = jnp.dot(x, w_ref[...], preferred_element_type=jnp.float32) + b_ref[...]

    # Numerically-stable softmax over the lane axis, all elementwise math in f32.
    m = jnp.max(logits, axis=-1, keepdims=True)
    e = jnp.exp(logits - m)
    denom = jnp.sum(e, axis=-1, keepdims=True)

    # EUP approximate reciprocal + one Newton refinement (row sums ~1e-6 of 1).
    inv = pl.reciprocal(denom, approx=True)
    inv = inv * (2.0 - denom * inv)

    o_ref[...] = (e * inv).astype(o_ref.dtype)


# ---------------------------------------------------------------------------
# One-time (parameter-load-time) preparation — hoisted out of the forward path.
# ---------------------------------------------------------------------------
def prepare_predictor_params(w, b, *, matmul_dtype=None):
    """Prepare nn.Linear params once (cache across forward calls).

    w: (F, D) in PyTorch nn.Linear layout, b: (F,)
    Returns:
      w_t : (D, F_pad) pre-transposed, zero-padded (optionally bf16)
      b_p : (1, F_pad) f32; padded lanes set to -1e30 (acts as the softmax pad mask)
      f_out : the real (unpadded) number of classes
    """
    f_out, d = w.shape
    f_pad = _round_up(f_out, 128)  # lane-dense output (unmasked vst)

    if matmul_dtype is None:
        # bf16 operands only pay off once the contraction is deep enough for the
        # MXU to matter; elementwise softmax stays f32 regardless.
        matmul_dtype = jnp.bfloat16 if d >= 512 else jnp.float32

    w_t = jnp.zeros((d, f_pad), matmul_dtype).at[:, :f_out].set(w.T.astype(matmul_dtype))
    # Padded W columns are exactly 0, so x @ W_t is 0 there; -1e30 bias on those
    # lanes makes exp() underflow to 0 -> softmax identical to the unpadded op.
    # Keep the sentinel finite (not -inf) so logits - max never produces NaN.
    b_p = jnp.full((1, f_pad), -1e30, jnp.float32).at[:, :f_out].set(b.astype(jnp.float32))
    return w_t, b_p, f_out


def _choose_batch_tile(batch, d, f_pad, *, vmem_budget_bytes=12 * 1024 * 1024):
    """Largest multiple-of-8 batch tile (<=1024) fitting a conservative VMEM
    budget, then evened out so the ragged tail doesn't overshoot `batch`."""
    bytes_per_row = 4 * 2 * (d + f_pad)          # x + out tiles, double-buffered, f32
    fixed = 4 * 2 * (d * f_pad + f_pad)          # resident weights + bias (double-buffered)
    cap = max(8, (vmem_budget_bytes - fixed) // bytes_per_row)
    cap = max(8, min(1024, (cap // 8) * 8))
    n_tiles = pl.cdiv(batch, cap)
    tm = _round_up(pl.cdiv(batch, n_tiles), 8)
    return max(8, min(tm, cap))


# ---------------------------------------------------------------------------
# Forward with pre-prepared params (the hot path).
# ---------------------------------------------------------------------------
def predictor_forward_prepared(x, w_t, b_p, f_out, *, tm=None, out_dtype=None):
    """softmax(x @ W.T + b, axis=-1). x: (B, D) -> (B, f_out)."""
    batch, d = x.shape
    f_pad = w_t.shape[1]
    if out_dtype is None:
        out_dtype = jnp.float32  # pass jnp.bfloat16 to halve HBM writeback if tolerated

    if tm is None:
        tm = _choose_batch_tile(batch, d, f_pad)

    # Ragged grid: no padded copy of x. Tail-block OOB input rows hold garbage,
    # but rows are independent and Pallas drops their output writes.
    grid = (pl.cdiv(batch, tm),)

    out = pl.pallas_call(
        _predictor_kernel,
        out_shape=jax.ShapeDtypeStruct((batch, f_pad), out_dtype),
        grid_spec=pltpu.PrefetchScalarGridSpec(
            num_scalar_prefetch=0,
            grid=grid,
            in_specs=[
                pl.BlockSpec((tm, d), lambda i: (i, 0)),      # batch tile of x
                pl.BlockSpec((d, f_pad), lambda i: (0, 0)),   # resident weights
                pl.BlockSpec((1, f_pad), lambda i: (0, 0)),   # resident bias (+pad mask)
            ],
            out_specs=pl.BlockSpec((tm, f_pad), lambda i: (i, 0)),
        ),
        compiler_params=pltpu.CompilerParams(
            dimension_semantics=("parallel",),  # shards the batch grid across TCs (v7x)
        ),
    )(x, w_t, b_p)

    if f_pad != f_out:
        out = out[:, :f_out]
    return out


def unsupervised_predictor_forward(x, w, b, **kwargs):
    """Convenience one-shot wrapper (prep + forward). For repeated calls, cache
    prepare_predictor_params() output and call predictor_forward_prepared."""
    w_t, b_p, f_out = prepare_predictor_params(w, b)
    return predictor_forward_prepared(x, w_t, b_p, f_out, **kwargs)


if __name__ == "__main__":
    # Small shapes consistent with the module: hidden_reprs of shape (batch, input_size)
    B = 8
    input_size = 32
    out_features = 16

    key = jax.random.PRNGKey(0)
    kx, kw, kb = jax.random.split(key, 3)

    # Deterministic parameter init (mimics nn.Linear's uniform(-1/sqrt(D), 1/sqrt(D)))
    bound = 1.0 / jnp.sqrt(jnp.float32(input_size))
    w = jax.random.uniform(kw, (out_features, input_size), jnp.float32, -bound, bound)
    b = jax.random.uniform(kb, (out_features,), jnp.float32, -bound, bound)
    x = jax.random.normal(kx, (B, input_size), jnp.float32)

    # Parameter prep happens once (per param update), not per forward call.
    w_t, b_p, f_out = prepare_predictor_params(w, b)
    w_t, b_p = jax.block_until_ready((w_t, b_p))

    out = predictor_forward_prepared(x, w_t, b_p, f_out)
    out = jax.block_until_ready(out)

    # Reference check in plain JAX
    ref = jax.nn.softmax(x @ w.T + b, axis=-1)
    assert out.shape == (B, out_features)
    assert jnp.allclose(out, ref, atol=1e-5, rtol=1e-5)
    assert jnp.allclose(jnp.sum(out, axis=-1), 1.0, atol=1e-5)

    print("KERNEL_OK")
</pallas_src>

<mosaic_0001>
module attributes {stable_mosaic.version = 11 : i64} {
  func.func @_predictor_kernel(%arg0: i32, %arg1: memref<8x32xf32, #tpu.memory_space<vmem>>, %arg2: memref<32x128xf32, #tpu.memory_space<vmem>>, %arg3: memref<1x128xf32, #tpu.memory_space<vmem>>, %arg4: memref<8x128xf32, #tpu.memory_space<vmem>>) attributes {dimension_semantics = [#tpu.dimension_semantics<parallel>], iteration_bounds = array<i64: 1>, scalar_prefetch = 0 : i64, scratch_operands = 0 : i64, tpu.core_type = #tpu.core_type<tc>, window_params = [{transform_indices = @transform_0, window_bounds = array<i64: 8, 32>}, {pipeline_mode = #tpu.pipeline_mode<synchronous>, transform_indices = @transform_1, window_bounds = array<i64: 32, 128>}, {pipeline_mode = #tpu.pipeline_mode<synchronous>, transform_indices = @transform_2, window_bounds = array<i64: 1, 128>}, {transform_indices = @transform_3, window_bounds = array<i64: 8, 128>}]} {
    %c0 = arith.constant 0 : index
    %c0_0 = arith.constant 0 : index
    %0 = vector.load %arg1[%c0, %c0_0] : memref<8x32xf32, #tpu.memory_space<vmem>>, vector<8x32xf32>
    %c0_1 = arith.constant 0 : index
    %c0_2 = arith.constant 0 : index
    %1 = vector.load %arg2[%c0_1, %c0_2] : memref<32x128xf32, #tpu.memory_space<vmem>>, vector<32x128xf32>
    %cst = arith.constant dense<0.000000e+00> : vector<8x128xf32>
    %2 = tpu.matmul %0, %1, %cst {dimension_numbers = #tpu.dot_dimension_numbers<[1], [0], [0], [1], [0, 0, 1, 1], [], []>} : vector<8x32xf32>, vector<32x128xf32>, vector<8x128xf32> -> vector<8x128xf32>
    %c0_3 = arith.constant 0 : index
    %c0_4 = arith.constant 0 : index
    %3 = vector.load %arg3[%c0_3, %c0_4] : memref<1x128xf32, #tpu.memory_space<vmem>>, vector<1x128xf32>
    %4 = vector.broadcast %3 : vector<1x128xf32> to vector<8x128xf32>
    %5 = arith.addf %2, %4 : vector<8x128xf32>
    %cst_5 = arith.constant dense<0xFF800000> : vector<8xf32>
    %6 = vector.multi_reduction <maximumf>, %5, %cst_5 [1] : vector<8x128xf32> to vector<8xf32>
    %7 = vector.shape_cast %6 : vector<8xf32> to vector<8x1xf32>
    %8 = vector.broadcast %7 : vector<8x1xf32> to vector<8x128xf32>
    %9 = arith.subf %5, %8 : vector<8x128xf32>
    %10 = math.exp %9 : vector<8x128xf32>
    %cst_6 = arith.constant dense<0.000000e+00> : vector<8xf32>
    %11 = vector.multi_reduction <add>, %10, %cst_6 [1] : vector<8x128xf32> to vector<8xf32>
    %12 = vector.shape_cast %11 : vector<8xf32> to vector<8x1xf32>
    %13 = tpu.reciprocal %12 {approx = true} : vector<8x1xf32> -> vector<8x1xf32>
    %14 = arith.mulf %12, %13 : vector<8x1xf32>
    %cst_7 = arith.constant 2.000000e+00 : f32
    %15 = vector.broadcast %cst_7 : f32 to vector<8x1xf32>
    %16 = arith.subf %15, %14 : vector<8x1xf32>
    %17 = arith.mulf %13, %16 : vector<8x1xf32>
    %18 = vector.broadcast %17 : vector<8x1xf32> to vector<8x128xf32>
    %19 = arith.mulf %10, %18 : vector<8x128xf32>
    %c0_8 = arith.constant 0 : index
    %c0_9 = arith.constant 0 : index
    %20 = vector.load %arg4[%c0_8, %c0_9] : memref<8x128xf32, #tpu.memory_space<vmem>>, vector<8x128xf32>
    tpu.vector_store %arg4[%c0_8, %c0_9], %19 {strides = array<i32>} : memref<8x128xf32, #tpu.memory_space<vmem>>, vector<8x128xf32>,
    return
  }
  func.func @transform_0(%arg0: i32) -> (i32, i32) {
    %c0_i32 = arith.constant 0 : i32
    %c0_i32_0 = arith.constant 0 : i32
    return %arg0, %c0_i32 : i32, i32
  }
  func.func @transform_1(%arg0: i32) -> (i32, i32) {
    %c0_i32 = arith.constant 0 : i32
    %c0_i32_0 = arith.constant 0 : i32
    %c0_i32_1 = arith.constant 0 : i32
    return %c0_i32, %c0_i32_0 : i32, i32
  }
  func.func @transform_2(%arg0: i32) -> (i32, i32) {
    %c0_i32 = arith.constant 0 : i32
    %c0_i32_0 = arith.constant 0 : i32
    %c0_i32_1 = arith.constant 0 : i32
    return %c0_i32, %c0_i32_0 : i32, i32
  }
  func.func @transform_3(%arg0: i32) -> (i32, i32) {
    %c0_i32 = arith.constant 0 : i32
    %c0_i32_0 = arith.constant 0 : i32
    return %arg0, %c0_i32 : i32, i32
  }
}

</mosaic_0001>

<bundles_post_ra>
// kernel: tpu_custom_call.1
= control target key start
LH: loop header
LB: loop body
LE: loop exit
PB: predicated region body
PF: predicated region fallthrough
CT: control target
= control target key end

     0   :  { %8 = vsyncpa [#allocation3], 0  ;;  %s338_s0 = inlined_call_operand.hbm [shape: f32[8,32], index: 0, kind: input, shape index: {}]   ;;  %s339_s1 = inlined_call_operand.hbm [shape: f32[32,128], index: 1, kind: input, shape index: {}]   ;;  %s340_s2 = inlined_call_operand.vmem [shape: f32[1,128], index: 2, kind: input, shape index: {}]   ;;  %s341_s3 = inlined_call_operand.hbm [shape: f32[8,128], index: 3, kind: output, shape index: {}]  }
   0x1   :  { %9 = vsyncpa [#allocation6], 0 }
   0x2   :  { %10 = vsyncpa [#allocation4], 0  ;;  %s264_s12 = smov [#allocation2]   ;;  %s265_s14 = smov [#allocation5]  }
   0x3   :  { %s17_s13 = sshll.u32 %s264_s12, 4  ;;  %s26_s15 = sshll.u32 %s265_s14, 4  ;;  %s18_s13 = int_to_ptr.vmem [resolvable:$true] %s17_s13  ;;  %s292_s15 = int_to_ptr.vmem [resolvable:$true] %s26_s15 }
   0x4   :  { %s192_s18 = scalar_lea.hbm %s338_s0, 128 }
   0x5   :  { %p193_p0 = scmp.ne.s32.totalorder %s338_s0, %s192_s18  ;;  %p196_p1 = scmp.lt.u32.totalorder %s192_s18, %s338_s0 }
   0x7   :  { %p198_p2 = pnand %p196_p1, %p193_p0 }
   0x9   :  { %201 = shalt.err (!%p198_p2)
}
   0xa   :  { %s202_s23 = scalar_lea.vmem %s18_s13, 128  ;;  %p207_p4 = scmp.lt.s32.totalorder %s18_s13, %s18_s13 }
   0xb   :  { %p203_p3 = scmp.ne.s32.totalorder %s18_s13, %s202_s23  ;;  %p208_p5 = scmp.lt.s32.totalorder %s202_s23, %s202_s23 }
   0xd   :  { %p209_p6 = por %p208_p5, %p207_p4 }
   0xf   :  { %p210_p7 = pnand %p209_p6, %p203_p3 }
  0x11   :  { %213 = shalt.err (!%p210_p7)
}
  0x12   :  { %20 = dma.hbm_to_vmem [thread:$0]  %s338_s0, 128, %s18_s13, [#allocation3]  }
  0x13   :  { %s214_s28 = scalar_lea.hbm %s339_s1, 512 }
  0x14   :  { %p215_p8 = scmp.ne.s32.totalorder %s339_s1, %s214_s28  ;;  %p218_p9 = scmp.lt.u32.totalorder %s214_s28, %s339_s1 }
  0x16   :  { %p220_p10 = pnand %p218_p9, %p215_p8 }
  0x18   :  { %223 = shalt.err (!%p220_p10)
}
  0x19   :  { %s224_s6 = scalar_lea.vmem %s292_s15, 512  ;;  %p229_p12 = scmp.lt.s32.totalorder %s292_s15, %s292_s15 }
  0x1a   :  { %p225_p11 = scmp.ne.s32.totalorder %s292_s15, %s224_s6  ;;  %p230_p13 = scmp.lt.s32.totalorder %s224_s6, %s224_s6 }
  0x1c   :  { %p231_p0 = por %p230_p13, %p229_p12 }
  0x1e   :  { %p232_p1 = pnand %p231_p0, %p225_p11 }
  0x20   :  { %235 = shalt.err (!%p232_p1)
}
  0x21   :  { %s266_s0 = smov 128   ;;  %s267_s7 = smov 8  }
  0x22   :  { %32 = dma.hbm_to_vmem [thread:$0]  %s339_s1, 512, %s292_s15, [#allocation6], %s266_s0, %s266_s0, %s267_s7  }
  0x23   :  { %258 = dma.done.wait [#allocation3], 128  }
  0x24   :  { %259 = vsyncadd [#allocation3], 4294967168 }
  0x25   :  { %260 = dma.done.wait [#allocation6], 512  }
  0x26   :  { %261 = vsyncadd [#allocation6], 4294966784  ;;  %v268_v0 = vmov 0.0|0.0   ;;  %vm269_vm0 = vmmov 0   ;;  %v270_v1 = vmov 0.0   ;;  %v42_v2 = vld [vmem:[#allocation5] sm:$0xff] }
  0x27   :  { %174 = vmatprep.subr.bf16.mxu0 %v268_v0  ;;  %171 = vmatprep.mubr.msk.f32.mxu0 %vm269_vm0, %v270_v1  ;;  %v43_v3 = vld [vmem:[#allocation5 + $0x8] sm:$0xff]  ;;  %v44_v4 = vld [vmem:[#allocation5 + $0x10] sm:$0xff]  ;;  %v45_v6 = vld [vmem:[#allocation5 + $0x18] sm:$0xff]  ;;  %vm53_vm1 = vcmask 261120   ;;  %s271_s11 = smov [#allocation7]  }
  0x28   :  { %v175_v5 = vpack.c.bf16 %v43_v3, %v42_v2  ;;  %v178_v7 = vpack.c.bf16 %v45_v6, %v44_v4  ;;  %v41_v8 = vld [vmem:[#allocation2] sm:$0xff]  ;;  %s146_s12 = sshll.u32 %s271_s11, 4  ;;  %s147_s12 = int_to_ptr.vmem [resolvable:$true] %s146_s12 }
  0x29   :  { %v156_v9 = vld [vmem:[%s340_s2] ss:$0 sm:$0xff]  ;;  %s236_s2 = scalar_lea.vmem %s147_s12, 128  ;;  %p241_p3 = scmp.lt.s32.totalorder %s147_s12, %s147_s12 }
  0x2a   :  { %176 = vmatpush3.bf16.msra.mxu0 %v175_v5  ;;  %p237_p2 = scmp.ne.s32.totalorder %s147_s12, %s236_s2  ;;  %p242_p4 = scmp.lt.s32.totalorder %s236_s2, %s236_s2 }
  0x2b   :  { %177 = vmatprep.subr.bf16.mxu0 %v268_v0 }
  0x2c   :  { %p243_p5 = por %p242_p4, %p241_p3 }
  0x2e   :  { %179 = vmatpush3.bf16.msra.mxu0 %v178_v7  ;;  %p244_p6 = pnand %p243_p5, %p237_p2 }
  0x31   :  { %172 = vmatmul.mubr.msk.f32.vlgmr.msra.gmra.mrb[0].mxu0 %vm53_vm1, %v41_v8 }
 0x104   :  { %v123_v10 = vpop.f32.mrb[0].mxu0 }
 0x105   :  { %v124_v11 = vadd.f32 %v156_v9, %v123_v10  ;;  %v173_v12 = vpop.f32.mrb[1].mxu0 }
 0x107   :  { %127 = vmax.xlane.f32.xlu0 %v124_v11 }
 0x194   :  { %v128_v13 = vpop.xlane.xlu0 %127 }
 0x195   :  { %v129_v14 = vsub.f32 %v124_v11, %v128_v13 }
 0x197   :  { %v130_v15 = vmul.f32 1.442695, %v129_v14 }
 0x199   :  { %188 = vpow2.f32 %v130_v15 }
 0x1a3   :  { %v189_v16 = vpop.eup %188 }
 0x1a4   :  { %132 = vadd.xlane.f32.xlu0 %v189_v16 }
 0x231   :  { %v133_v17 = vpop.xlane.xlu0 %132 }
 0x232   :  { %190 = vrcp.f32 %v133_v17 }
 0x23c   :  { %v191_v18 = vpop.eup %190 }
 0x23d   :  { %v135_v19 = vmul.f32 %v191_v18, %v133_v17 }
 0x23f   :  { %v136_v20 = vsub.f32 2.0, %v135_v19 }
 0x241   :  { %v137_v21 = vmul.f32 %v191_v18, %v136_v20 }
 0x243   :  { %v138_v22 = vmul.f32 %v189_v16, %v137_v21 }
 0x245   :  { %139 = vst [vmem:[#allocation7] sm:$0xff] %v138_v22 }
 0x246   :  { %247 = shalt.err (!%p244_p6)
}
 0x247   :  { %s248_s15 = scalar_lea.hbm %s341_s3, 128 }
 0x248   :  { %p249_p7 = scmp.ne.s32.totalorder %s341_s3, %s248_s15  ;;  %p252_p8 = scmp.lt.u32.totalorder %s248_s15, %s341_s3 }
 0x24a   :  { %p254_p9 = pnand %p252_p8, %p249_p7 }
 0x24c   :  { %257 = shalt.err (!%p254_p9)
}
 0x24d   :  { %149 = dma.vmem_to_hbm [thread:$0]  %s147_s12, 128, %s341_s3, [#allocation4]  }
 0x24e   :  { %262 = dma.done.wait [#allocation4], 128  }
 0x24f   :  { %263 = vsyncadd [#allocation4], 4294967168 }
 0x250   :  { %153 = vsyncpa [#allocation3], 1 }
 0x251   :  { %154 = vsyncpa [#allocation6], 1 }
 0x252   :  { %155 = vsyncpa [#allocation4], 1 }

</bundles_post_ra>
